<compile_context>
chip_gen: v5e
topology: v5e:2x2
jax: 0.10.0
libtpu: 0.0.40
codegen_flags: <defaults>
</compile_context>

<pallas_src>
import functools
import math

import jax
import jax.numpy as jnp
from jax.experimental import pallas as pl
from jax.experimental.pallas import tpu as pltpu

# Layer sizes from the PyTorch module: n_inputs -> 20 -> 12 -> 8 -> 6 -> 1
HIDDEN_SIZES = (20, 12, 8, 6, 1)

_LANES = 128
# The (TILE_B, n_inputs) input block is lane-padded to 128 lanes in VMEM, so at
# 8192 the double-buffered x stream costs 2 * 8192*128*4 B = 8 MiB; with bf16
# intermediates the whole kernel is ~10-12 MiB -> fits the 32 MiB scoped VMEM
# limit on v5e/v6e/v7x alike.  v5e/v6e (128 MiB physical) may pass larger
# tile_b explicitly.
_TILE_B_MAX = 8192
_KERNEL_BATCH_THRESHOLD = 1024  # below this, XLA-fused path beats kernel overhead


def _round_up(x, m):
    return (x + m - 1) // m * m


def _pick_tile_b(padded_batch, tile_b):
    if tile_b is None:
        tile_b = min(_TILE_B_MAX, padded_batch)
        # Keep >=2 grid steps whenever possible so the "parallel" batch axis
        # can shard across both TensorCores on v7x (no-op on 1-TC v5e/v6e).
        if padded_batch >= 2 * _LANES:
            tile_b = min(tile_b, _round_up(-(-padded_batch // 2), _LANES))
    tile_b = max(_LANES, _round_up(int(tile_b), _LANES))
    return min(tile_b, padded_batch)


def _fast_sigmoid(pre_f32, act_dtype):
    # sigmoid(x) = 0.5 * (tanh(x/2) + 1): one EUP transcendental instead of
    # exp + divide, computed in act_dtype (bf16 on v6e/v7x, f32 on v5e).
    z = (pre_f32 * 0.5).astype(act_dtype)
    return jnp.tanh(z) * 0.5 + 0.5


def _mlp_kernel(x_ref,
                w1_ref, b1_ref, w2_ref, b2_ref,
                w3_ref, b3_ref, w4_ref, b4_ref,
                w5_ref, b5_ref,
                o_ref, *, act_dtype):
    """Fused forward; activations carried as (features, TILE_B): batch on lanes."""
    # Layer 1 as an NT matmul on the MXU:
    #   (20, n_in) . (TILE_B, n_in)^T -> (20, TILE_B), f32 accumulation.
    # Lets the kernel read x in its natural (batch, n_inputs) HBM layout.
    x = x_ref[...].astype(w1_ref.dtype)
    pre = jax.lax.dot_general(
        w1_ref[...], x,
        dimension_numbers=(((1,), (1,)), ((), ())),
        preferred_element_type=jnp.float32) + b1_ref[...]
    h = _fast_sigmoid(pre, act_dtype)
    for w_ref, b_ref in ((w2_ref, b2_ref), (w3_ref, b3_ref), (w4_ref, b4_ref)):
        # MXU: (out, in) @ (in, TILE_B); bias add in f32; sigmoid in act_dtype,
        # so when act_dtype == MXU dtype there is no per-layer re-cast.
        pre = jnp.dot(w_ref[...], h.astype(w_ref.dtype),
                      preferred_element_type=jnp.float32) + b_ref[...]
        h = _fast_sigmoid(pre, act_dtype)
    # Final 6 -> 1 layer on the VPU: column-weighted sublane reduction
    # (avoids a padded MXU matmul with M=1, K=6); lane-dense (1, TILE_B) store.
    out = (jnp.sum(w5_ref[...] * h.astype(jnp.float32), axis=0, keepdims=True)
           + b5_ref[...])
    o_ref[...] = out.astype(o_ref.dtype)


def _mlp_forward_pallas(x, params, compute_dtype, act_dtype, tile_b):
    batch, n_inputs = x.shape
    padded = _round_up(batch, _LANES)
    if padded != batch:
        # Only unaligned/tiny batches pay this copy; lane-aligned batches stream
        # x straight from HBM with no wrapper-side relayout pass at all.
        x = jnp.pad(x, ((0, padded - batch), (0, 0)))
    tile_b = _pick_tile_b(padded, tile_b)
    num_tiles = pl.cdiv(padded, tile_b)   # partial last block: OOB reads are
                                          # per-lane independent, OOB writes dropped.

    w1, b1, w2, b2, w3, b3, w4, b4, w5, b5 = params
    # MXU layers: PyTorch-native (out, in) weights in compute dtype, f32 (out,1) biases.
    mxu_ws = [w.astype(compute_dtype) for w in (w1, w2, w3, w4)]
    mxu_bs = [b.reshape(-1, 1).astype(jnp.float32) for b in (b1, b2, b3, b4)]
    # Final 6 -> 1 layer runs on the VPU in f32: weight as a (6, 1) column.
    w5_col = w5.T.astype(jnp.float32)             # (6, 1)
    b5_s = b5.reshape(1, 1).astype(jnp.float32)   # (1, 1)

    # Weights/biases: full-block, constant index map -> VMEM-resident across tiles.
    const_spec = lambda a: pl.BlockSpec(a.shape, lambda i: (0, 0))
    kernel_args, param_specs = [], []
    for w, b in zip(mxu_ws, mxu_bs):
        kernel_args += [w, b]
        param_specs += [const_spec(w), const_spec(b)]
    kernel_args += [w5_col, b5_s]
    param_specs += [const_spec(w5_col), const_spec(b5_s)]

    out_t = pl.pallas_call(
        functools.partial(_mlp_kernel, act_dtype=jnp.dtype(act_dtype)),
        out_shape=jax.ShapeDtypeStruct((1, padded), jnp.float32),
        grid=(num_tiles,),
        in_specs=[pl.BlockSpec((tile_b, n_inputs), lambda i: (i, 0))] + param_specs,
        out_specs=pl.BlockSpec((1, tile_b), lambda i: (0, i)),
        compiler_params=pltpu.CompilerParams(
            dimension_semantics=("parallel",),
            vmem_limit_bytes=32 * 1024 * 1024,
        ),
    )(x, *kernel_args)

    # Back to the PyTorch layout: (batch, 1), dropping batch padding.
    return out_t[0, :batch].reshape(batch, 1)


@functools.partial(jax.jit,
                   static_argnames=("force_kernel", "compute_dtype",
                                    "act_dtype", "tile_b"))
def mlp_forward(x, params, force_kernel=False,
                compute_dtype=jnp.bfloat16, act_dtype=None, tile_b=None):
    """x: (batch, n_inputs) f32; params: [w1,b1,...,w5,b5] in PyTorch layout.

    compute_dtype: MXU operand dtype (bf16 recommended on v6e/v7x).
    act_dtype: sigmoid/elementwise dtype; defaults to compute_dtype.
               On v5e (no bf16 VPU/EUP) use compute_dtype=bf16, act_dtype=f32.
    """
    if act_dtype is None:
        act_dtype = compute_dtype
    batch = x.shape[0]
    if force_kernel or batch >= _KERNEL_BATCH_THRESHOLD:
        return _mlp_forward_pallas(x, params, compute_dtype, act_dtype, tile_b)
    # Tiny batches: pallas_call fixed overhead dominates; let XLA fuse directly.
    return reference_forward(x, params)


def _xavier_uniform(key, fan_out, fan_in):
    # torch.nn.init.xavier_uniform_ (gain=1) on a (out_features, in_features) weight.
    limit = math.sqrt(6.0 / (fan_in + fan_out))
    return jax.random.uniform(key, (fan_out, fan_in), jnp.float32, -limit, limit)


def _bias_init(key, fan_in, fan_out):
    # PyTorch Linear default bias init: U(-1/sqrt(fan_in), 1/sqrt(fan_in)).
    bound = 1.0 / math.sqrt(fan_in)
    return jax.random.uniform(key, (fan_out,), jnp.float32, -bound, bound)


def make_params(key, n_inputs):
    """PyTorch-native layout: W_i is (out_features, in_features), b_i is (out_features,)."""
    dims = (n_inputs,) + HIDDEN_SIZES
    params = []
    for i in range(len(HIDDEN_SIZES)):
        key, kw, kb = jax.random.split(key, 3)
        fan_in, fan_out = dims[i], dims[i + 1]
        params.append(_xavier_uniform(kw, fan_out, fan_in))
        params.append(_bias_init(kb, fan_in, fan_out))
    return params


def reference_forward(x, params):
    """Pure-JAX f32 reference with PyTorch Linear semantics: h @ W.T + b."""
    h = x.astype(jnp.float32)
    for i in range(5):
        w, b = params[2 * i], params[2 * i + 1]
        h = jnp.dot(h, w.T.astype(jnp.float32),
                    preferred_element_type=jnp.float32) + b
        if i < 4:
            h = jax.nn.sigmoid(h)
    return h


if __name__ == "__main__":
    key = jax.random.PRNGKey(0)
    kx, kxs, kp = jax.random.split(key, 3)

    n_inputs = 16
    params = make_params(kp, n_inputs)

    batch = 384
    x = jax.random.normal(kx, (batch, n_inputs), jnp.float32)
    ref = reference_forward(x, params)

    # Multi-tile pipelined path (3 grid steps of 128 lanes), default bf16.
    out_bf16 = jax.block_until_ready(
        mlp_forward(x, params, force_kernel=True, tile_b=128))
    assert out_bf16.shape == (batch, 1), out_bf16.shape
    assert jnp.allclose(out_bf16, ref, atol=5e-2, rtol=5e-2), "bf16 kernel mismatch"

    # Auto tile selection (2 tiles of 256 with a partial last block).
    out_auto = jax.block_until_ready(mlp_forward(x, params, force_kernel=True))
    assert jnp.allclose(out_auto, ref, atol=5e-2, rtol=5e-2), "auto-tile mismatch"

    # f32 MXU + f32 activations: tight match against the f32 reference.
    out_f32 = jax.block_until_ready(
        mlp_forward(x, params, force_kernel=True,
                    compute_dtype=jnp.float32, tile_b=128))
    assert jnp.allclose(out_f32, ref, atol=1e-3, rtol=1e-3), "f32 kernel mismatch"

    # bf16 MXU operands + f32 elementwise path (recommended v5e configuration).
    out_mixed = jax.block_until_ready(
        mlp_forward(x, params, force_kernel=True,
                    compute_dtype=jnp.bfloat16, act_dtype=jnp.float32, tile_b=256))
    assert jnp.allclose(out_mixed, ref, atol=5e-2, rtol=5e-2), "mixed kernel mismatch"

    # Tiny unaligned batch: kernel path with lane padding + the XLA-fused fallback.
    xs = jax.random.normal(kxs, (8, n_inputs), jnp.float32)
    ref_small = reference_forward(xs, params)
    out_small_kernel = jax.block_until_ready(
        mlp_forward(xs, params, force_kernel=True, compute_dtype=jnp.float32))
    assert jnp.allclose(out_small_kernel, ref_small, atol=1e-3, rtol=1e-3)
    out_small_fused = jax.block_until_ready(mlp_forward(xs, params))
    assert jnp.allclose(out_small_fused, ref_small, atol=1e-5, rtol=1e-5)

    print("KERNEL_OK")
</pallas_src>

<mosaic_0001>
module attributes {stable_mosaic.version = 11 : i64} {
  func.func @_mlp_kernel(%arg0: i32, %arg1: memref<128x16xf32, #tpu.memory_space<vmem>>, %arg2: memref<20x16xbf16, #tpu.memory_space<vmem>>, %arg3: memref<20x1xf32, #tpu.memory_space<vmem>>, %arg4: memref<12x20xbf16, #tpu.memory_space<vmem>>, %arg5: memref<12x1xf32, #tpu.memory_space<vmem>>, %arg6: memref<8x12xbf16, #tpu.memory_space<vmem>>, %arg7: memref<8x1xf32, #tpu.memory_space<vmem>>, %arg8: memref<6x8xbf16, #tpu.memory_space<vmem>>, %arg9: memref<6x1xf32, #tpu.memory_space<vmem>>, %arg10: memref<6x1xf32, #tpu.memory_space<vmem>>, %arg11: memref<1x1xf32, #tpu.memory_space<vmem>>, %arg12: memref<1x128xf32, #tpu.memory_space<vmem>>) attributes {dimension_semantics = [#tpu.dimension_semantics<parallel>], iteration_bounds = array<i64: 3>, scalar_prefetch = 0 : i64, scratch_operands = 0 : i64, tpu.core_type = #tpu.core_type<tc>, window_params = [{transform_indices = @transform_0, window_bounds = array<i64: 128, 16>}, {pipeline_mode = #tpu.pipeline_mode<synchronous>, transform_indices = @transform_1, window_bounds = array<i64: 20, 16>}, {pipeline_mode = #tpu.pipeline_mode<synchronous>, transform_indices = @transform_2, window_bounds = array<i64: 20, 1>}, {pipeline_mode = #tpu.pipeline_mode<synchronous>, transform_indices = @transform_3, window_bounds = array<i64: 12, 20>}, {pipeline_mode = #tpu.pipeline_mode<synchronous>, transform_indices = @transform_4, window_bounds = array<i64: 12, 1>}, {pipeline_mode = #tpu.pipeline_mode<synchronous>, transform_indices = @transform_5, window_bounds = array<i64: 8, 12>}, {pipeline_mode = #tpu.pipeline_mode<synchronous>, transform_indices = @transform_6, window_bounds = array<i64: 8, 1>}, {pipeline_mode = #tpu.pipeline_mode<synchronous>, transform_indices = @transform_7, window_bounds = array<i64: 6, 8>}, {pipeline_mode = #tpu.pipeline_mode<synchronous>, transform_indices = @transform_8, window_bounds = array<i64: 6, 1>}, {pipeline_mode = #tpu.pipeline_mode<synchronous>, transform_indices = @transform_9, window_bounds = array<i64: 6, 1>}, {pipeline_mode = #tpu.pipeline_mode<synchronous>, transform_indices = @transform_10, window_bounds = array<i64: 1, 1>}, {transform_indices = @transform_11, window_bounds = array<i64: 1, 128>}]} {
    %c0 = arith.constant 0 : index
    %c0_0 = arith.constant 0 : index
    %0 = vector.load %arg1[%c0, %c0_0] : memref<128x16xf32, #tpu.memory_space<vmem>>, vector<128x16xf32>
    %1 = arith.truncf %0 : vector<128x16xf32> to vector<128x16xbf16>
    %c0_1 = arith.constant 0 : index
    %c0_2 = arith.constant 0 : index
    %2 = vector.load %arg2[%c0_1, %c0_2] : memref<20x16xbf16, #tpu.memory_space<vmem>>, vector<20x16xbf16>
    %cst = arith.constant dense<0.000000e+00> : vector<20x128xf32>
    %3 = tpu.matmul %2, %1, %cst {dimension_numbers = #tpu.dot_dimension_numbers<[1], [1], [0], [0], [0, 0, 1, 0], [], []>} : vector<20x16xbf16>, vector<128x16xbf16>, vector<20x128xf32> -> vector<20x128xf32>
    %c0_3 = arith.constant 0 : index
    %c0_4 = arith.constant 0 : index
    %4 = vector.load %arg3[%c0_3, %c0_4] : memref<20x1xf32, #tpu.memory_space<vmem>>, vector<20x1xf32>
    %5 = vector.broadcast %4 : vector<20x1xf32> to vector<20x128xf32>
    %6 = arith.addf %3, %5 : vector<20x128xf32>
    %cst_5 = arith.constant 5.000000e-01 : f32
    %7 = vector.broadcast %cst_5 : f32 to vector<20x128xf32>
    %8 = arith.mulf %6, %7 : vector<20x128xf32>
    %9 = arith.truncf %8 : vector<20x128xf32> to vector<20x128xbf16>
    %10 = math.tanh %9 : vector<20x128xbf16>
    %cst_6 = arith.constant 5.000000e-01 : bf16
    %11 = vector.broadcast %cst_6 : bf16 to vector<20x128xbf16>
    %12 = arith.mulf %10, %11 : vector<20x128xbf16>
    %cst_7 = arith.constant 5.000000e-01 : bf16
    %13 = vector.broadcast %cst_7 : bf16 to vector<20x128xbf16>
    %14 = arith.addf %12, %13 : vector<20x128xbf16>
    %c0_8 = arith.constant 0 : index
    %c0_9 = arith.constant 0 : index
    %15 = vector.load %arg4[%c0_8, %c0_9] : memref<12x20xbf16, #tpu.memory_space<vmem>>, vector<12x20xbf16>
    %cst_10 = arith.constant dense<0.000000e+00> : vector<12x128xf32>
    %16 = tpu.matmul %15, %14, %cst_10 {dimension_numbers = #tpu.dot_dimension_numbers<[1], [0], [0], [1], [0, 0, 1, 1], [], []>} : vector<12x20xbf16>, vector<20x128xbf16>, vector<12x128xf32> -> vector<12x128xf32>
    %c0_11 = arith.constant 0 : index
    %c0_12 = arith.constant 0 : index
    %17 = vector.load %arg5[%c0_11, %c0_12] : memref<12x1xf32, #tpu.memory_space<vmem>>, vector<12x1xf32>
    %18 = vector.broadcast %17 : vector<12x1xf32> to vector<12x128xf32>
    %19 = arith.addf %16, %18 : vector<12x128xf32>
    %cst_13 = arith.constant 5.000000e-01 : f32
    %20 = vector.broadcast %cst_13 : f32 to vector<12x128xf32>
    %21 = arith.mulf %19, %20 : vector<12x128xf32>
    %22 = arith.truncf %21 : vector<12x128xf32> to vector<12x128xbf16>
    %23 = math.tanh %22 : vector<12x128xbf16>
    %cst_14 = arith.constant 5.000000e-01 : bf16
    %24 = vector.broadcast %cst_14 : bf16 to vector<12x128xbf16>
    %25 = arith.mulf %23, %24 : vector<12x128xbf16>
    %cst_15 = arith.constant 5.000000e-01 : bf16
    %26 = vector.broadcast %cst_15 : bf16 to vector<12x128xbf16>
    %27 = arith.addf %25, %26 : vector<12x128xbf16>
    %c0_16 = arith.constant 0 : index
    %c0_17 = arith.constant 0 : index
    %28 = vector.load %arg6[%c0_16, %c0_17] : memref<8x12xbf16, #tpu.memory_space<vmem>>, vector<8x12xbf16>
    %cst_18 = arith.constant dense<0.000000e+00> : vector<8x128xf32>
    %29 = tpu.matmul %28, %27, %cst_18 {dimension_numbers = #tpu.dot_dimension_numbers<[1], [0], [0], [1], [0, 0, 1, 1], [], []>} : vector<8x12xbf16>, vector<12x128xbf16>, vector<8x128xf32> -> vector<8x128xf32>
    %c0_19 = arith.constant 0 : index
    %c0_20 = arith.constant 0 : index
    %30 = vector.load %arg7[%c0_19, %c0_20] : memref<8x1xf32, #tpu.memory_space<vmem>>, vector<8x1xf32>
    %31 = vector.broadcast %30 : vector<8x1xf32> to vector<8x128xf32>
    %32 = arith.addf %29, %31 : vector<8x128xf32>
    %cst_21 = arith.constant 5.000000e-01 : f32
    %33 = vector.broadcast %cst_21 : f32 to vector<8x128xf32>
    %34 = arith.mulf %32, %33 : vector<8x128xf32>
    %35 = arith.truncf %34 : vector<8x128xf32> to vector<8x128xbf16>
    %36 = math.tanh %35 : vector<8x128xbf16>
    %cst_22 = arith.constant 5.000000e-01 : bf16
    %37 = vector.broadcast %cst_22 : bf16 to vector<8x128xbf16>
    %38 = arith.mulf %36, %37 : vector<8x128xbf16>
    %cst_23 = arith.constant 5.000000e-01 : bf16
    %39 = vector.broadcast %cst_23 : bf16 to vector<8x128xbf16>
    %40 = arith.addf %38, %39 : vector<8x128xbf16>
    %c0_24 = arith.constant 0 : index
    %c0_25 = arith.constant 0 : index
    %41 = vector.load %arg8[%c0_24, %c0_25] : memref<6x8xbf16, #tpu.memory_space<vmem>>, vector<6x8xbf16>
    %cst_26 = arith.constant dense<0.000000e+00> : vector<6x128xf32>
    %42 = tpu.matmul %41, %40, %cst_26 {dimension_numbers = #tpu.dot_dimension_numbers<[1], [0], [0], [1], [0, 0, 1, 1], [], []>} : vector<6x8xbf16>, vector<8x128xbf16>, vector<6x128xf32> -> vector<6x128xf32>
    %c0_27 = arith.constant 0 : index
    %c0_28 = arith.constant 0 : index
    %43 = vector.load %arg9[%c0_27, %c0_28] : memref<6x1xf32, #tpu.memory_space<vmem>>, vector<6x1xf32>
    %44 = vector.broadcast %43 : vector<6x1xf32> to vector<6x128xf32>
    %45 = arith.addf %42, %44 : vector<6x128xf32>
    %cst_29 = arith.constant 5.000000e-01 : f32
    %46 = vector.broadcast %cst_29 : f32 to vector<6x128xf32>
    %47 = arith.mulf %45, %46 : vector<6x128xf32>
    %48 = arith.truncf %47 : vector<6x128xf32> to vector<6x128xbf16>
    %49 = math.tanh %48 : vector<6x128xbf16>
    %cst_30 = arith.constant 5.000000e-01 : bf16
    %50 = vector.broadcast %cst_30 : bf16 to vector<6x128xbf16>
    %51 = arith.mulf %49, %50 : vector<6x128xbf16>
    %cst_31 = arith.constant 5.000000e-01 : bf16
    %52 = vector.broadcast %cst_31 : bf16 to vector<6x128xbf16>
    %53 = arith.addf %51, %52 : vector<6x128xbf16>
    %c0_32 = arith.constant 0 : index
    %c0_33 = arith.constant 0 : index
    %54 = vector.load %arg10[%c0_32, %c0_33] : memref<6x1xf32, #tpu.memory_space<vmem>>, vector<6x1xf32>
    %55 = arith.extf %53 : vector<6x128xbf16> to vector<6x128xf32>
    %56 = vector.broadcast %54 : vector<6x1xf32> to vector<6x128xf32>
    %57 = arith.mulf %56, %55 : vector<6x128xf32>
    %cst_34 = arith.constant dense<0.000000e+00> : vector<128xf32>
    %58 = vector.multi_reduction <add>, %57, %cst_34 [0] : vector<6x128xf32> to vector<128xf32>
    %59 = vector.shape_cast %58 : vector<128xf32> to vector<1x128xf32>
    %c0_35 = arith.constant 0 : index
    %c0_36 = arith.constant 0 : index
    %60 = vector.load %arg11[%c0_35, %c0_36] : memref<1x1xf32, #tpu.memory_space<vmem>>, vector<1x1xf32>
    %61 = vector.broadcast %60 : vector<1x1xf32> to vector<1x128xf32>
    %62 = arith.addf %59, %61 : vector<1x128xf32>
    %c0_37 = arith.constant 0 : index
    %c0_38 = arith.constant 0 : index
    %63 = vector.load %arg12[%c0_37, %c0_38] : memref<1x128xf32, #tpu.memory_space<vmem>>, vector<1x128xf32>
    tpu.vector_store %arg12[%c0_37, %c0_38], %62 {strides = array<i32>} : memref<1x128xf32, #tpu.memory_space<vmem>>, vector<1x128xf32>,
    return
  }
  func.func @transform_0(%arg0: i32) -> (i32, i32) {
    %c0_i32 = arith.constant 0 : i32
    %c0_i32_0 = arith.constant 0 : i32
    return %arg0, %c0_i32 : i32, i32
  }
  func.func @transform_1(%arg0: i32) -> (i32, i32) {
    %c0_i32 = arith.constant 0 : i32
    %c0_i32_0 = arith.constant 0 : i32
    %c0_i32_1 = arith.constant 0 : i32
    return %c0_i32, %c0_i32_0 : i32, i32
  }
  func.func @transform_2(%arg0: i32) -> (i32, i32) {
    %c0_i32 = arith.constant 0 : i32
    %c0_i32_0 = arith.constant 0 : i32
    %c0_i32_1 = arith.constant 0 : i32
    return %c0_i32, %c0_i32_0 : i32, i32
  }
  func.func @transform_3(%arg0: i32) -> (i32, i32) {
    %c0_i32 = arith.constant 0 : i32
    %c0_i32_0 = arith.constant 0 : i32
    %c0_i32_1 = arith.constant 0 : i32
    return %c0_i32, %c0_i32_0 : i32, i32
  }
  func.func @transform_4(%arg0: i32) -> (i32, i32) {
    %c0_i32 = arith.constant 0 : i32
    %c0_i32_0 = arith.constant 0 : i32
    %c0_i32_1 = arith.constant 0 : i32
    return %c0_i32, %c0_i32_0 : i32, i32
  }
  func.func @transform_5(%arg0: i32) -> (i32, i32) {
    %c0_i32 = arith.constant 0 : i32
    %c0_i32_0 = arith.constant 0 : i32
    %c0_i32_1 = arith.constant 0 : i32
    return %c0_i32, %c0_i32_0 : i32, i32
  }
  func.func @transform_6(%arg0: i32) -> (i32, i32) {
    %c0_i32 = arith.constant 0 : i32
    %c0_i32_0 = arith.constant 0 : i32
    %c0_i32_1 = arith.constant 0 : i32
    return %c0_i32, %c0_i32_0 : i32, i32
  }
  func.func @transform_7(%arg0: i32) -> (i32, i32) {
    %c0_i32 = arith.constant 0 : i32
    %c0_i32_0 = arith.constant 0 : i32
    %c0_i32_1 = arith.constant 0 : i32
    return %c0_i32, %c0_i32_0 : i32, i32
  }
  func.func @transform_8(%arg0: i32) -> (i32, i32) {
    %c0_i32 = arith.constant 0 : i32
    %c0_i32_0 = arith.constant 0 : i32
    %c0_i32_1 = arith.constant 0 : i32
    return %c0_i32, %c0_i32_0 : i32, i32
  }
  func.func @transform_9(%arg0: i32) -> (i32, i32) {
    %c0_i32 = arith.constant 0 : i32
    %c0_i32_0 = arith.constant 0 : i32
    %c0_i32_1 = arith.constant 0 : i32
    return %c0_i32, %c0_i32_0 : i32, i32
  }
  func.func @transform_10(%arg0: i32) -> (i32, i32) {
    %c0_i32 = arith.constant 0 : i32
    %c0_i32_0 = arith.constant 0 : i32
    %c0_i32_1 = arith.constant 0 : i32
    return %c0_i32, %c0_i32_0 : i32, i32
  }
  func.func @transform_11(%arg0: i32) -> (i32, i32) {
    %c0_i32 = arith.constant 0 : i32
    %c0_i32_0 = arith.constant 0 : i32
    return %c0_i32, %arg0 : i32, i32
  }
}

</mosaic_0001>

<bundles_post_ra>
// kernel: mlp_forward.1
= control target key start
LH: loop header
LB: loop body
LE: loop exit
PB: predicated region body
PF: predicated region fallthrough
CT: control target
= control target key end

     0   :  { %s1119_s0 = inlined_call_operand.vmem [shape: f32[384,16], index: 0, kind: input, shape index: {}]   ;;  %s1120_s1 = inlined_call_operand.vmem [shape: bf16[20,16], index: 1, kind: input, shape index: {}]   ;;  %s1121_s2 = inlined_call_operand.vmem [shape: f32[20,1], index: 2, kind: input, shape index: {}]   ;;  %s1122_s3 = inlined_call_operand.vmem [shape: bf16[12,20], index: 3, kind: input, shape index: {}]   ;;  %s1123_s4 = inlined_call_operand.vmem [shape: f32[12,1], index: 4, kind: input, shape index: {}]   ;;  %s1124_s5 = inlined_call_operand.vmem [shape: bf16[8,12], index: 5, kind: input, shape index: {}]   ;;  %s1125_s6 = inlined_call_operand.vmem [shape: f32[8,1], index: 6, kind: input, shape index: {}]   ;;  %s1126_s7 = inlined_call_operand.vmem [shape: bf16[6,8], index: 7, kind: input, shape index: {}]   ;;  %s1127_s8 = inlined_call_operand.vmem [shape: f32[6,1], index: 8, kind: input, shape index: {}]   ;;  %s1128_s9 = inlined_call_operand.vmem [shape: f32[6,1], index: 9, kind: input, shape index: {}]   ;;  %s1129_s10 = inlined_call_operand.<no memory space> [shape: f32[1,1], index: 10, kind: input, shape index: {}]   ;;  %s1130_s11 = inlined_call_operand.hbm [shape: f32[1,384], index: 11, kind: output, shape index: {}]  }
   0x1   :  { %v16_v0 = vstv %s1129_s10 }
   0x2   :  { %17 = vst [vmem:[#allocation2] sm:$0x1] %v16_v0 }
   0x3   :  { %18 = vsyncpa [#allocation4], 0 }
   0x4   :  { %20 = vsyncpa [#allocation4 + $0x1], 0  ;;  %s963_s19 = smov 0   ;;  %s965_s20 = smov 0  }
   0x5   :  { %s967_s21 = smov 0   ;;  %s969_s22 = smov 0  }
   0x6 LB: > { %s984_s10 = sadd.s32 4294967295, %s897_s22   ;;  %s755_s23 = sadd.s32 4294967294, %s897_s22   ;;  %s897_s22 = sphi %s969_s22, %s1136_s22   ;;  %s893_s21 = sphi %s967_s21, %s1135_s21   ;;  %s889_s20 = sphi %s965_s20, %s1134_s20   ;;  %s885_s19 = sphi %s963_s19, %s1133_s19  }
   0x7   : > { %s988_s24 = sadd.s32 1, %s897_s22   ;;  %s269_s25 = sadd.s32 1, %s893_s21 }
   0x8   : > { %s266_s26 = ssub.s32 %s897_s22, %s988_s24  ;;  %p279_p0 = scmp.ne.s32.totalorder %s893_s21, %s889_s20 }
   0x9   : > { %p267_p1 = scmp.eq.s32.totalorder %s266_s26, 0  ;;  %p280_p2 = scmp.eq.s32.totalorder %s984_s10, 2 }
   0xa   : > { %p285_p3 = scmp.ne.s32.totalorder %s889_s20, %s885_s19  ;;  %p286_p4 = scmp.eq.s32.totalorder %s755_s23, 2 }
   0xb   : > { %s999_s27 = scalar_select %p267_p1, %s893_s21, %s269_s25  }
   0xc   : > { %p1001_p5 = por %p280_p2, %p279_p0  ;;  %p1005_p6 = por %p286_p4, %p285_p3 }
   0xd   : > { %p758_p7 = scmp.ge.s32.totalorder %s897_s22, 1  ;;  %p343_p8 = scmp.lt.s32.totalorder %s897_s22, 4 }
   0xf   : > { %p344_p9 = pnand %p758_p7, %p343_p8 }
  0x10   : > { %s759_s30 = sshll.u32 (!%p344_p9), %s984_s10, 4  ;;  %s696_s14 = scalar_lea.hbm (!%p344_p9), %s1130_s11, %s984_s10 }
  0x11   : > { %347 = sbr.rel (%p344_p9) target bundleno = 786 (0x312), region = 64  ;;  %p383_p10 = scmp.lt.s32.totalorder (!%p344_p9), %s759_s30, 47 }
  0x16   : > { %s1138_s30 = smov (!%p383_p10, %s759_s30), 47  ;;  %vm442_vm0 = vcmask 130048   ;;  %v418_v23 = vld [vmem:[%s1121_s2 + $0x10] sm:$0xf]  ;;  %v417_v24 = vld [vmem:[%s1121_s2 + $0x8] sm:$0xff]  ;;  %v899_v25 = vmov 0  }
  0x17   : > { %s760_s12 = sshll.u32 %s1138_s30, 3  ;;  %818 = vset.pattern.permute.xlu0 %v899_v25  ;;  %819 = vset.pattern.permute.xlu1 %v899_v25  ;;  %v416_v30 = vld [vmem:[%s1121_s2] sm:$0xff]  ;;  %v415_v41 = vld [vmem:[%s1120_s1 + $0x8] sm:$0x3]  ;;  %vm546_vm1 = vcmask 1041408   ;;  %vm542_vm2 = vcmask 162816  }
  0x18   : > { %s1015_s15 = scalar_lea.vmem %s1119_s0, %s760_s12  ;;  %431 = vperm.xlu0 %818, %v418_v23   ;;  %426 = vperm.xlu1 %819, %v417_v24   ;;  %v525_v35 = vld [vmem:[%s1123_s4] sm:$0xff]  ;;  %v439_v42 = vunpack.c.l.b16 %v415_v41  ;;  %v526_v61 = vld [vmem:[%s1123_s4 + $0x8] sm:$0xf]  ;;  %vm596_vm3 = vcmask 1045504   ;;  %vm592_vm4 = vcmask 97280   ;;  %vm635_vm5 = vcmask 1043456  }
  0x19   : > { %v403_v1 = vld [vmem:[%s1015_s15 + $0x70] sm:$0xff]  ;;  %v404_v2 = vld [vmem:[%s1015_s15 + $0x78] sm:$0xff]  ;;  %v401_v4 = vld [vmem:[%s1015_s15 + $0x60] sm:$0xff]  ;;  %820 = vset.pattern.permute.xlu2 %v899_v25  ;;  %vm631_vm6 = vcmask 64512   ;;  %s380_s30 = sand.u32 1, %s889_s20   ;;  %s855_s12 = scalar_lea.hbm %s1130_s11, 3 }
  0x1a   : > { %v412_v3 = vpack.c.bf16 %v404_v2, %v403_v1  ;;  %v402_v5 = vld [vmem:[%s1015_s15 + $0x68] sm:$0xff]  ;;  %v399_v9 = vld [vmem:[%s1015_s15 + $0x50] sm:$0xff]  ;;  %v400_v10 = vld [vmem:[%s1015_s15 + $0x58] sm:$0xff]  ;;  %v441_v43 = vpack.c.b16 %v439_v42, %v439_v42  ;;  %534 = vperm.xlu2 %820, %v526_v61   ;;  %s381_s16 = scalar_lea.vmem [#allocation3], %s380_s30  ;;  %s688_s18 = scalar_lea.sflag [#allocation4], %s380_s30 }
  0x1b   : > { %v411_v7 = vpack.c.bf16 %v402_v5, %v401_v4  ;;  %v410_v11 = vpack.c.bf16 %v400_v10, %v399_v9  ;;  %v397_v13 = vld [vmem:[%s1015_s15 + $0x40] sm:$0xff]  ;;  %v398_v14 = vld [vmem:[%s1015_s15 + $0x48] sm:$0xff]  ;;  %v395_v17 = vld [vmem:[%s1015_s15 + $0x30] sm:$0xff]  ;;  %s698_s17 = sshll.u32 %s381_s16, 4  ;;  %s699_s17 = int_to_ptr.vmem [resolvable:$true] %s698_s17 }
  0x1c   : > { %v471_v6 = vsel %vm442_vm0, %v412_v3, 0  ;;  %v409_v15 = vpack.c.bf16 %v398_v14, %v397_v13  ;;  %v396_v18 = vld [vmem:[%s1015_s15 + $0x38] sm:$0xff]  ;;  %v393_v21 = vld [vmem:[%s1015_s15 + $0x20] sm:$0xff]  ;;  %v394_v22 = vld [vmem:[%s1015_s15 + $0x28] sm:$0xff] }
  0x1d   : > { %473 = vmatpush.bf16.xpose.msra.mxu0 %v471_v6  ;;  %v468_v8 = vsel %vm442_vm0, %v411_v7, 0  ;;  %v465_v12 = vsel %vm442_vm0, %v410_v11, 0  ;;  %v408_v19 = vpack.c.bf16 %v396_v18, %v395_v17  ;;  %v407_v26 = vpack.c.bf16 %v394_v22, %v393_v21  ;;  %v391_v28 = vld [vmem:[%s1015_s15 + $0x10] sm:$0xff]  ;;  %v392_v29 = vld [vmem:[%s1015_s15 + $0x18] sm:$0xff]  ;;  %v389_v33 = vld [vmem:[%s1015_s15] sm:$0xff] }
  0x1e   : > { %v462_v16 = vsel %vm442_vm0, %v409_v15, 0  ;;  %v406_v31 = vpack.c.bf16 %v392_v29, %v391_v28  ;;  %v390_v34 = vld [vmem:[%s1015_s15 + $0x8] sm:$0xff]  ;;  %v625_v36 = vld [vmem:[%s1127_s8] sm:$0x3f]  ;;  %s700_s15 = sshll.u32 %s696_s14, 4  ;;  %s701_s15 = int_to_ptr.hbm [resolvable:$true] %s700_s15 }
  0x1f   : > { %v459_v20 = vsel %vm442_vm0, %v408_v19, 0  ;;  %v456_v27 = vsel %vm442_vm0, %v407_v26, 0  ;;  %v405_v37 = vpack.c.bf16 %v390_v34, %v389_v33  ;;  %v663_v39 = vld [vmem:[%s1128_s9] sm:$0x3f]  ;;  %s849_s23 = sshra.s32 %s701_s15, 4  ;;  %s850_s23 = int_to_ptr.hbm [resolvable:$true] %s849_s23 }
  0x20   : > { %421 = vperm.xlu0 %818, %v416_v30   ;;  %v453_v32 = vsel %vm442_vm0, %v406_v31, 0  ;;  %529 = vperm.xlu1 %819, %v525_v35   ;;  %v776_v40 = vld [vmem:[%s1120_s1] sm:$0xff]  ;;  %s851_s25 = scalar_lea.hbm %s850_s23, 1  ;;  %p856_p0 = scmp.lt.s32.totalorder %s850_s23, %s1130_s11 }
  0x21   : > { %v450_v38 = vsel %vm442_vm0, %v405_v37, 0  ;;  %v586_v4 = vld [vmem:[%s1125_s6] sm:$0xff]  ;;  %p852_p11 = scmp.ne.s32.totalorder %s850_s23, %s851_s25  ;;  %p857_p1 = scmp.lt.s32.totalorder %s855_s12, %s851_s25 }
  0x22   : > { %589 = vperm.xlu2 %820, %v586_v4   ;;  %v678_v13 = vld [vmem:[#allocation2] sm:$0x1]  ;;  %v777_v26 = vld [vmem:[%s1122_s3] sm:$0x30] }
  0x23   : > { %v769_v25 = vld [vmem:[%s1122_s3] sm:$0xf]  ;;  %p853_p12 = pnand %p852_p11, %p1001_p5  ;;  %p858_p2 = por %p857_p1, %p856_p0 }
  0x24   : > { %v770_v28 = vor.u32 %v777_v26, %v769_v25 }
  0x25   : > { %474 = vmatpush.bf16.xpose.msra.mxu0 %v468_v8  ;;  %p854_p13 = pneg %p853_p12 }
  0x27   : > { %p859_p3 = pnand %p858_p2, %p854_p13 }
  0x28   : > { %628 = vperm.xlu0 %818, %v625_v36   ;;  %667 = vperm.xlu1 %819, %v663_v39  }
  0x2a   : > { %681 = vperm.xlu2 %820, %v678_v13  }
  0x2d   : > { %475 = vmatpush.bf16.xpose.msra.mxu0 %v465_v12 }
  0x35   : > { %476 = vmatpush.bf16.xpose.msra.mxu0 %v462_v16 }
  0x3d   : > { %477 = vmatpush.bf16.xpose.msra.mxu0 %v459_v20 }
  0x45   : > { %478 = vmatpush.bf16.xpose.msra.mxu0 %v456_v27 }
  0x4d   : > { %479 = vmatpush.bf16.xpose.msra.mxu0 %v453_v32 }
  0x55   : > { %480 = vmatpush.bf16.xpose.msra.mxu0 %v450_v38 }
  0x5c   : > { %765 = vmatmul.msk.bf16.vlgmr.msra.gmra.mxu0 %vm442_vm0, %v776_v40 }
  0x6c   : > { %766 = vmatmul.msk.bf16.gmra.mxu0 %vm442_vm0, %v441_v43 }
  0x74   : > { %v535_v35 = vpop.permute.xlu2 %534 }
  0x8a   : > { %v432_v44 = vpop.permute.xlu0 %431  ;;  %v427_v49 = vpop.permute.xlu1 %426 }
  0x92   : > { %v422_v45 = vpop.permute.xlu0 %421  ;;  %v530_v29 = vpop.permute.xlu1 %529 }
  0xd9   : > { %v482_v46 = vpop.f32.mrf.mxu0 }
  0xda   : > { %v483_v47 = vadd.f32 %v482_v46, %v422_v45 }
  0xdc   : > { %v491_v48 = vmul.f32 0.5, %v483_v47 }
  0xde   : > { %v494_v52 = vpack.c.bf16 %v491_v48, %v491_v48 }
  0xe0   : > { %v497_v55 = vunpack.c.l.bf16 %v494_v52 }
  0xe1   : > { %v484_v50 = vpop.f32.mrf.mxu0 }
  0xe2   : > { %v485_v51 = vadd.f32 %v484_v50, %v427_v49 }
  0xe4   : > { %v492_v53 = vmul.f32 0.5, %v485_v51 }
  0xe6   : > { %v495_v54 = vpack.c.bf16 %v492_v53, %v492_v53 }
  0xe8   : > { %v498_v56 = vunpack.c.l.bf16 %v495_v54 }
  0xe9   : > { %v487_v57 = vpop.f32.mrf.mxu0 }
  0xea   : > { %821 = vtanh.f32 %v498_v56  ;;  %v488_v58 = vadd.f32 %v487_v57, %v432_v44  ;;  %v585_v57 = vld [vmem:[%s1124_s5] sm:$0xf] }
  0xeb   : > { %823 = vtanh.f32 %v497_v55 }
  0xec   : > { %v493_v59 = vmul.f32 0.5, %v488_v58  ;;  %v590_v58 = vpop.permute.xlu2 %589 }
  0xee   : > { %v496_v60 = vpack.c.bf16 %v493_v59, %v493_v59 }
  0xf0   : > { %v822_v62 = vpop.eup %821  ;;  %v499_v63 = vunpack.c.l.bf16 %v496_v60 }
  0xf1   : > { %v824_v0 = vpop.eup %823  ;;  %v489_v1 = vpop.f32.mrf.mxu0  ;;  %v504_v2 = vpack.c.bf16 %v822_v62, %v822_v62 }
  0xf2   : > { %825 = vtanh.f32 %v499_v63  ;;  %v503_v3 = vpack.c.bf16 %v824_v0, %v824_v0 }
  0xf3   : > { %v507_v5 = vunpack.c.l.bf16 %v504_v2 }
  0xf4   : > { %v506_v7 = vunpack.c.l.bf16 %v503_v3 }
  0xf5   : > { %v510_v9 = vmul.f32 0.5, %v507_v5 }
  0xf6   : > { %v509_v11 = vmul.f32 0.5, %v506_v7 }
  0xf7   : > { %v513_v14 = vpack.c.bf16 %v510_v9, %v510_v9 }
  0xf8   : > { %v826_v6 = vpop.eup %825  ;;  %v512_v16 = vpack.c.bf16 %v509_v11, %v509_v11  ;;  %v629_v11 = vpop.permute.xlu0 %628 }
  0xf9   : > { %v505_v8 = vpack.c.bf16 %v826_v6, %v826_v6  ;;  %v516_v18 = vunpack.c.l.bf16 %v513_v14 }
  0xfa   : > { %v515_v20 = vunpack.c.l.bf16 %v512_v16 }
  0xfb   : > { %v508_v10 = vunpack.c.l.bf16 %v505_v8  ;;  %v519_v22 = vadd.f32 0.5, %v516_v18 }
  0xfc   : > { %v518_v24 = vadd.f32 0.5, %v515_v20 }
  0xfd   : > { %v511_v12 = vmul.f32 0.5, %v508_v10  ;;  %v624_v10 = vld [vmem:[%s1126_s7] sm:$0x7] }
  0xfe   : > { %v521_v27 = vpack.c.bf16 %v519_v22, %v518_v24 }
  0xff   : > { %v514_v15 = vpack.c.bf16 %v511_v12, %v511_v12 }
 0x101   : > { %v517_v17 = vunpack.c.l.bf16 %v514_v15 }
 0x103   : > { %v520_v19 = vadd.f32 0.5, %v517_v17 }
 0x105   : > { %v522_v21 = vpack.c.bf16 %v520_v19, %v520_v19 }
 0x107   : > { %v548_v23 = vsel %vm546_vm1, %v522_v21, 0 }
 0x108   : > { %556 = vmatpush.bf16.msra.mxu1 %v548_v23 }
 0x10c   : > { %557 = vmatpush.bf16.msra.mxu1 %v521_v27  ;;  %v668_v27 = vpop.permute.xlu1 %667 }
 0x10f   : > { %771 = vmatmul.msk.bf16.vlgmr.msra.gmra.mxu1 %vm542_vm2, %v770_v28 }
 0x18c   : > { %v559_v30 = vpop.f32.mrf.mxu1 }
 0x18d   : > { %v560_v31 = vadd.f32 %v559_v30, %v530_v29 }
 0x18f   : > { %v564_v32 = vmul.f32 0.5, %v560_v31 }
 0x191   : > { %v566_v33 = vpack.c.bf16 %v564_v32, %v564_v32 }
 0x193   : > { %v568_v34 = vunpack.c.l.bf16 %v566_v33 }
 0x194   : > { %v561_v36 = vpop.f32.mrf.mxu1 }
 0x195   : > { %827 = vtanh.f32 %v568_v34  ;;  %v562_v37 = vadd.f32 %v561_v36, %v535_v35  ;;  %v682_v34 = vpop.permute.xlu2 %681 }
 0x196   : > { %v684_v36 = vperm.slane %v682_v34, 0 }
 0x197   : > { %v565_v38 = vmul.f32 0.5, %v562_v37 }
 0x199   : > { %v567_v39 = vpack.c.bf16 %v565_v38, %v565_v38 }
 0x19b   : > { %v828_v40 = vpop.eup %827  ;;  %v569_v41 = vunpack.c.l.bf16 %v567_v39 }
 0x19c   : > { %v572_v42 = vpack.c.bf16 %v828_v40, %v828_v40 }
 0x19d   : > { %829 = vtanh.f32 %v569_v41 }
 0x19e   : > { %v574_v43 = vunpack.c.l.bf16 %v572_v42 }
 0x1a0   : > { %v576_v44 = vmul.f32 0.5, %v574_v43 }
 0x1a2   : > { %v578_v48 = vpack.c.bf16 %v576_v44, %v576_v44 }
 0x1a3   : > { %v830_v45 = vpop.eup %829 }
 0x1a4   : > { %v573_v46 = vpack.c.bf16 %v830_v45, %v830_v45  ;;  %v580_v51 = vunpack.c.l.bf16 %v578_v48 }
 0x1a6   : > { %v575_v47 = vunpack.c.l.bf16 %v573_v46  ;;  %v582_v53 = vadd.f32 0.5, %v580_v51 }
 0x1a8   : > { %v577_v49 = vmul.f32 0.5, %v575_v47 }
 0x1aa   : > { %v579_v50 = vpack.c.bf16 %v577_v49, %v577_v49 }
 0x1ac   : > { %v581_v52 = vunpack.c.l.bf16 %v579_v50 }
 0x1ae   : > { %v583_v54 = vadd.f32 0.5, %v581_v52 }
 0x1b0   : > { %v584_v55 = vpack.c.bf16 %v583_v54, %v582_v53 }
 0x1b2   : > { %v598_v56 = vsel %vm596_vm3, %v584_v55, 0 }
 0x1b3   : > { %607 = vmatpush.bf16.msra.mxu2 %v598_v56 }
 0x1b6   : > { %772 = vmatmul.msk.bf16.vlgmr.msra.gmra.mxu2 %vm592_vm4, %v585_v57 }
 0x239   : > { %v609_v59 = vpop.f32.mrf.mxu2 }
 0x23a   : > { %v610_v60 = vadd.f32 %v609_v59, %v590_v58 }
 0x23c   : > { %v613_v61 = vmul.f32 0.5, %v610_v60 }
 0x23e   : > { %v614_v62 = vpack.c.bf16 %v613_v61, %v613_v61 }
 0x240   : > { %v615_v63 = vunpack.c.l.bf16 %v614_v62 }
 0x241   : > { %v611_v0 = vpop.f32.mrf.mxu2 }
 0x242   : > { %831 = vtanh.f32 %v615_v63 }
 0x248   : > { %v832_v1 = vpop.eup %831 }
 0x249   : > { %v617_v2 = vpack.c.bf16 %v832_v1, %v832_v1 }
 0x24b   : > { %v618_v3 = vunpack.c.l.bf16 %v617_v2 }
 0x24d   : > { %v619_v4 = vmul.f32 0.5, %v618_v3 }
 0x24f   : > { %v620_v5 = vpack.c.bf16 %v619_v4, %v619_v4 }
 0x251   : > { %v621_v6 = vunpack.c.l.bf16 %v620_v5 }
 0x253   : > { %v622_v7 = vadd.f32 0.5, %v621_v6 }
 0x255   : > { %v623_v8 = vpack.c.bf16 %v622_v7, %v622_v7 }
 0x257   : > { %v637_v9 = vsel %vm635_vm5, %v623_v8, 0 }
 0x258   : > { %646 = vmatpush.bf16.msra.mxu3 %v637_v9 }
 0x25b   : > { %773 = vmatmul.msk.bf16.vlgmr.msra.gmra.mxu3 %vm631_vm6, %v624_v10 }
 0x2de   : > { %v648_v12 = vpop.f32.mrf.mxu3 }
 0x2df   : > { %v649_v13 = vadd.f32 %v648_v12, %v629_v11 }
 0x2e1   : > { %v652_v14 = vmul.f32 0.5, %v649_v13 }
 0x2e3   : > { %v653_v15 = vpack.c.bf16 %v652_v14, %v652_v14 }
 0x2e5   : > { %v654_v16 = vunpack.c.l.bf16 %v653_v15 }
 0x2e6   : > { %v650_v17 = vpop.f32.mrf.mxu3 }
 0x2e7   : > { %833 = vtanh.f32 %v654_v16 }
 0x2ed   : > { %v834_v18 = vpop.eup %833 }
 0x2ee   : > { %v656_v19 = vpack.c.bf16 %v834_v18, %v834_v18 }
 0x2f0   : > { %v657_v20 = vunpack.c.l.bf16 %v656_v19 }
 0x2f2   : > { %v658_v21 = vmul.f32 0.5, %v657_v20 }
 0x2f4   : > { %v659_v22 = vpack.c.bf16 %v658_v21, %v658_v21 }
 0x2f6   : > { %v660_v23 = vunpack.c.l.bf16 %v659_v22 }
 0x2f8   : > { %v661_v24 = vadd.f32 0.5, %v660_v23 }
 0x2fa   : > { %v662_v25 = vpack.c.bf16 %v661_v24, %v661_v24 }
 0x2fc   : > { %v664_v26 = vunpack.c.l.bf16 %v662_v25 }
 0x2fe   : > { %v670_v28 = vmul.f32 %v668_v27, %v664_v26 }
 0x300   : > { %v671_v29 = vsel %vm596_vm3, %v670_v28, 0.0 }
 0x301   : > { %v672_v30 = vrot.slane %v671_v29, 4 }
 0x303   : > { %v673_v31 = vadd.f32 %v672_v30, %v671_v29 }
 0x305   : > { %v674_v32 = vrot.slane %v673_v31, 2 }
 0x307   : > { %v675_v33 = vadd.f32 %v674_v32, %v673_v31 }
 0x309   : > { %v676_v35 = vrot.slane %v675_v33, 1 }
 0x30b   : > { %v677_v37 = vadd.f32 %v676_v35, %v675_v33 }
 0x30d   : > { %v685_v38 = vadd.f32 %v684_v36, %v677_v37 }
 0x30f   : > { %686 = vst [vmem:[%s381_s16] sm:$0x1] %v685_v38 }
 0x310   : > { %862 = shalt.err (!%p859_p3)
}
 0x311   : > { %778 = dma.vmem_to_hbm [thread:$0]  (%p1001_p5), %s699_s17, 16, %s701_s15, %s688_s18  }
 0x312 PF: > { %p784_p4 = scmp.ge.s32.totalorder %s897_s22, 2  ;;  %s712_s30 = sand.u32 1, %s885_s19  }
 0x313   : > { %s713_s16 = scalar_lea.sflag [#allocation4], %s712_s30 }
 0x314   : > { %p781_p7 = pnand %p784_p4, %p1005_p6 }
 0x316   : > { %p782_p8 = pneg %p781_p7 }
 0x318   : > { %880 = dma.done.wait (%p782_p8), %s713_s16, 16  }
 0x319   : > { %882 = vsyncadd (%p782_p8), %s713_s16, 4294967280  ;;  %p23_p9 = scmp.ge.s32.totalorder %s988_s24, 5   ;;  %s1133_s19 = smov %s889_s20 }
 0x31a   : > { %s1134_s20 = smov %s893_s21  ;;  %s1135_s21 = smov %s999_s27 }
 0x31b   : > { %s1136_s22 = smov %s988_s24  ;;  %25 = sbr.rel (!%p23_p9) target bundleno = 6 (0x6), region = 99 }
 0x320   :  { %718 = vsyncpa [#allocation4], 1 }
 0x321   :  { %720 = vsyncpa [#allocation4 + $0x1], 1 }

</bundles_post_ra>
